<compile_context>
chip_gen: v7x
topology: tpu7x:2x2x1
jax: 0.10.0
libtpu: 0.0.40
codegen_flags: <defaults>
</compile_context>

<pallas_src>
import functools

import numpy as np
import jax
import jax.numpy as jnp
from jax import lax
from jax.experimental import pallas as pl
from jax.experimental.pallas import tpu as pltpu


def _round_up(n, m):
    return ((n + m - 1) // m) * m


def _sdm_kernel(x_ref, mask_ref, w12_ref, w3_ref, b12_ref, b3_ref, fb_ref,
                o_ref, midp_ref, *, H, W, K, pad, C, start):
    """Fused ScaleDecouplingModule forward for one image.

    x_ref   : (1, Cp, Lf)      bf16  zero-padded image, spatial flattened
                                     (padding + bf16 cast done in the wrapper)
    mask_ref: (1, Mf)          bf16  1.0 where (flat column mod Wp) < W
    w12_ref : (C+C4p, K*K*Cp)  bf16  [3x3 enhancer (BN1 folded) ;
                                      1x1 suppressor (BN2 folded, center tap)]
    w3_ref  : (C, K*K*C4p)     bf16  suppressor 3x3 conv, BN3 folded
    b12_ref : (C+C4p, 1)       f32   folded BN1/BN2 shifts
    b3_ref  : (C, 1)           f32   folded BN3 shift
    fb_ref  : (1,)             f32   feature_balance (SMEM scalar)
    o_ref   : (1, C, Mf)       f32   lane-dense output incl. Wp-W halo columns
                                     (halo stripped in the wrapper)
    midp_ref: (C4p, Lm)        bf16  VMEM scratch: zero-padded flat `mid`
    """
    Wp = W + 2 * pad
    Mf = H * Wp
    x_flat = x_ref[0]                                    # (Cp, Lf) bf16

    # ---- im2col over the padded image: K*K stride-1 lane slices ------------
    taps = []
    for kh in range(K):
        for kw in range(K):
            off = kh * Wp + kw
            taps.append(x_flat[:, off:off + Mf])
    patches = jnp.concatenate(taps, axis=0)              # (K*K*Cp, Mf) bf16

    # ---- fused conv1 (3x3) + conv2 (1x1): ONE MXU contraction --------------
    res = jnp.dot(w12_ref[...], patches,
                  preferred_element_type=jnp.float32) + b12_ref[...]
    enh = jnp.maximum(res[:C], 0.0)                      # (C, Mf)   enhancer
    mid = jnp.maximum(res[C:], 0.0)                      # (C4p, Mf) suppressor
    # zero the wrap-around (halo) columns so conv3 sees true zero padding
    mid = mid.astype(midp_ref.dtype) * mask_ref[...]

    # ---- place `mid` into its zero-padded flat buffer -----------------------
    # only the two margins need zeroing; the interior is fully overwritten by
    # one lane-aligned store (start is a multiple of 128).
    C4p_, Lm = midp_ref.shape
    midp_ref[:, :start] = jnp.zeros((C4p_, start), midp_ref.dtype)
    midp_ref[:, start + Mf:Lm] = jnp.zeros((C4p_, Lm - start - Mf),
                                           midp_ref.dtype)
    midp_ref[:, start:start + Mf] = mid

    # ---- conv3 (3x3, BN3 folded) over mid + sigmoid -------------------------
    base = start - (pad * Wp + pad)
    taps3 = []
    for kh in range(K):
        for kw in range(K):
            off = base + kh * Wp + kw
            taps3.append(midp_ref[:, off:off + Mf])
    patches3 = jnp.concatenate(taps3, axis=0)            # (K*K*C4p, Mf) bf16

    z = jnp.dot(w3_ref[...], patches3,
                preferred_element_type=jnp.float32) + b3_ref[...]
    sup = pl.reciprocal(1.0 + jnp.exp(-z), approx=True)  # sigmoid via EUP recip

    # ---- decoupled = enhanced * (1 - suppress * feature_balance) -----------
    dec = enh * (1.0 - fb_ref[0] * sup)                  # (C, Mf) f32
    o_ref[0] = dec.astype(o_ref.dtype)                   # single lane-dense store


def _fold_bn(w_oihw, gamma, beta, mean, var, eps):
    """Fold an eval-mode BatchNorm2d into the preceding conv (per out-channel)."""
    scale = gamma / jnp.sqrt(var + eps)
    return w_oihw * scale[:, None, None, None], beta - mean * scale


@jax.jit
def scale_decoupling_forward(x, conv1_w, bn1, conv2_w, bn2, conv3_w, bn3,
                             feature_balance):
    """ScaleDecouplingModule.forward (eval mode), NCHW in -> NCHW out."""
    eps = 1e-5                                   # PyTorch BatchNorm2d default
    N, C, H, W = x.shape
    K = conv1_w.shape[-1]
    pad = K // 2
    C4 = conv2_w.shape[0]
    assert K % 2 == 1
    assert conv1_w.shape == (C, C, K, K)
    assert conv2_w.shape == (C4, C, 1, 1)
    assert conv3_w.shape == (C, C4, K, K)

    # Fold eval-mode BN into the conv weights / biases (weight-sized glue only).
    w1f, b1 = _fold_bn(conv1_w, *bn1, eps)
    w2f, b2 = _fold_bn(conv2_w, *bn2, eps)
    w3f, b3 = _fold_bn(conv3_w, *bn3, eps)

    Cp = _round_up(C, 16)                  # bf16 sublane-tile aligned channels
    C4p = _round_up(C4, 16)
    Wp = W + 2 * pad
    Hp = H + 2 * pad + 1                   # +1 zero row keeps tap slices in-bounds
    Lf = Hp * Wp
    Mf = H * Wp

    # Stacked conv1(3x3)+conv2(1x1) MXU weight, tap-major to match im2col.
    w1m = jnp.transpose(w1f, (0, 2, 3, 1))                       # (C,K,K,C)
    w1m = jnp.pad(w1m, ((0, 0), (0, 0), (0, 0), (0, Cp - C)))
    w1m = w1m.reshape(C, K * K * Cp)
    w2p = jnp.pad(w2f.reshape(C4, C), ((0, C4p - C4), (0, Cp - C)))
    w2blk = jnp.zeros((C4p, K, K, Cp), w2p.dtype).at[:, pad, pad, :].set(w2p)
    w2blk = w2blk.reshape(C4p, K * K * Cp)
    w12 = jnp.concatenate([w1m, w2blk], axis=0).astype(jnp.bfloat16)

    w3m = jnp.transpose(w3f, (0, 2, 3, 1))                       # (C,K,K,C4)
    w3m = jnp.pad(w3m, ((0, 0), (0, 0), (0, 0), (0, C4p - C4)))
    w3m = w3m.reshape(C, K * K * C4p).astype(jnp.bfloat16)

    b12 = jnp.concatenate([b1, jnp.pad(b2, (0, C4p - C4))])
    b12 = b12.reshape(C + C4p, 1).astype(jnp.float32)
    b3 = b3.reshape(C, 1).astype(jnp.float32)
    fb = jnp.reshape(feature_balance, (1,)).astype(jnp.float32)

    # Wrapper-side zero padding + bf16 cast; flatten spatial (free reshape).
    x_pad = jnp.pad(x.astype(jnp.bfloat16),
                    ((0, 0), (0, Cp - C), (pad, pad + 1), (pad, pad)))
    x_flat = x_pad.reshape(N, Cp, Lf)

    # Compile-time interior-column mask (zero on the Wp-W wrap-around columns).
    m2 = np.zeros((H, Wp), np.float32)
    m2[:, :W] = 1.0
    mask = jnp.asarray(m2.reshape(1, Mf), dtype=jnp.bfloat16)

    # `mid` scratch geometry: lane-aligned interior start + zeroed margins.
    start = _round_up(pad * Wp + pad, 128)
    Lm = _round_up(start + Mf + (pad + 1) * Wp, 128)

    kernel = functools.partial(_sdm_kernel, H=H, W=W, K=K, pad=pad, C=C,
                               start=start)

    out_flat = pl.pallas_call(
        kernel,
        out_shape=jax.ShapeDtypeStruct((N, C, Mf), x.dtype),
        grid_spec=pltpu.PrefetchScalarGridSpec(
            num_scalar_prefetch=0,
            grid=(N,),                     # one image per (parallel) grid step
            in_specs=[
                pl.BlockSpec((1, Cp, Lf), lambda n: (n, 0, 0)),
                pl.BlockSpec((1, Mf), lambda n: (0, 0)),
                pl.BlockSpec((C + C4p, K * K * Cp), lambda n: (0, 0)),
                pl.BlockSpec((C, K * K * C4p), lambda n: (0, 0)),
                pl.BlockSpec((C + C4p, 1), lambda n: (0, 0)),
                pl.BlockSpec((C, 1), lambda n: (0, 0)),
                pl.BlockSpec(memory_space=pltpu.MemorySpace.SMEM),
            ],
            out_specs=pl.BlockSpec((1, C, Mf), lambda n: (n, 0, 0)),
            scratch_shapes=[pltpu.VMEM((C4p, Lm), jnp.bfloat16)],
        ),
        compiler_params=pltpu.CompilerParams(
            dimension_semantics=("parallel",),
            vmem_limit_bytes=48 * 1024 * 1024),
    )(x_flat, mask, w12, w3m, b12, b3, fb)

    # Free metadata reshape + cheap slice: strip the Wp-W halo columns.
    return out_flat.reshape(N, C, H, Wp)[:, :, :, :W]


if __name__ == "__main__":
    # Small P3-level test shapes consistent with the module (channels % 4 == 0).
    N, C, H, W = 2, 16, 16, 16
    K = 3
    C4 = C // 4
    eps = 1e-5

    key = jax.random.PRNGKey(0)
    ks = jax.random.split(key, 8)

    x = jax.random.normal(ks[0], (N, C, H, W), jnp.float32)

    def conv_init(k, shape):
        fan_in = shape[1] * shape[2] * shape[3]
        lim = 1.0 / (fan_in ** 0.5)
        return jax.random.uniform(k, shape, jnp.float32, -lim, lim)

    conv1_w = conv_init(ks[1], (C, C, K, K))
    conv2_w = conv_init(ks[2], (C4, C, 1, 1))
    conv3_w = conv_init(ks[3], (C, C4, K, K))

    def bn_init(k, ch):
        kg, kb, km, kv = jax.random.split(k, 4)
        gamma = jax.random.uniform(kg, (ch,), jnp.float32, 0.8, 1.2)
        beta = 0.1 * jax.random.normal(kb, (ch,), jnp.float32)
        mean = 0.1 * jax.random.normal(km, (ch,), jnp.float32)
        var = jax.random.uniform(kv, (ch,), jnp.float32, 0.8, 1.2)
        return gamma, beta, mean, var

    bn1 = bn_init(ks[4], C)
    bn2 = bn_init(ks[5], C4)
    bn3 = bn_init(ks[6], C)
    feature_balance = jnp.float32(0.8)

    out = scale_decoupling_forward(x, conv1_w, bn1, conv2_w, bn2,
                                   conv3_w, bn3, feature_balance)
    out = jax.block_until_ready(out)

    # Pure-JAX f32 reference of the PyTorch module (eval mode).
    def conv(inp, w, p):
        return lax.conv_general_dilated(
            inp, w, (1, 1), ((p, p), (p, p)),
            dimension_numbers=("NCHW", "OIHW", "NCHW"))

    def bnorm(y, params):
        g, b, m, v = params
        inv = (g / jnp.sqrt(v + eps))[None, :, None, None]
        return (y - m[None, :, None, None]) * inv + b[None, :, None, None]

    enhanced = jax.nn.relu(bnorm(conv(x, conv1_w, K // 2), bn1))
    mid = jax.nn.relu(bnorm(conv(x, conv2_w, 0), bn2))
    suppress = jax.nn.sigmoid(bnorm(conv(mid, conv3_w, K // 2), bn3))
    ref = enhanced * (1.0 - suppress * feature_balance)

    assert out.shape == (N, C, H, W)
    assert jnp.allclose(out, ref, atol=3e-2, rtol=3e-2), (
        f"max abs err = {float(jnp.max(jnp.abs(out - ref)))}")
    print("KERNEL_OK")
</pallas_src>

<mosaic_0001>
module attributes {stable_mosaic.version = 11 : i64} {
  func.func @_sdm_kernel(%arg0: i32, %arg1: memref<1x16x342xbf16, #tpu.memory_space<vmem>>, %arg2: memref<1x288xbf16, #tpu.memory_space<vmem>>, %arg3: memref<32x144xbf16, #tpu.memory_space<vmem>>, %arg4: memref<16x144xbf16, #tpu.memory_space<vmem>>, %arg5: memref<32x1xf32, #tpu.memory_space<vmem>>, %arg6: memref<16x1xf32, #tpu.memory_space<vmem>>, %arg7: memref<1xf32, #tpu.memory_space<smem>>, %arg8: memref<1x16x288xf32, #tpu.memory_space<vmem>>, %arg9: memref<16x512xbf16, #tpu.memory_space<vmem>>) attributes {dimension_semantics = [#tpu.dimension_semantics<parallel>], iteration_bounds = array<i64: 2>, scalar_prefetch = 0 : i64, scratch_operands = 1 : i64, tpu.core_type = #tpu.core_type<tc>, window_params = [{transform_indices = @transform_0, window_bounds = array<i64: 1, 16, 342>}, {pipeline_mode = #tpu.pipeline_mode<synchronous>, transform_indices = @transform_1, window_bounds = array<i64: 1, 288>}, {pipeline_mode = #tpu.pipeline_mode<synchronous>, transform_indices = @transform_2, window_bounds = array<i64: 32, 144>}, {pipeline_mode = #tpu.pipeline_mode<synchronous>, transform_indices = @transform_3, window_bounds = array<i64: 16, 144>}, {pipeline_mode = #tpu.pipeline_mode<synchronous>, transform_indices = @transform_4, window_bounds = array<i64: 32, 1>}, {pipeline_mode = #tpu.pipeline_mode<synchronous>, transform_indices = @transform_5, window_bounds = array<i64: 16, 1>}, {transform_indices = @transform_6, window_bounds = array<i64: 1>}, {transform_indices = @transform_7, window_bounds = array<i64: 1, 16, 288>}]} {
    %c0 = arith.constant 0 : index
    %c0_0 = arith.constant 0 : index
    %c0_1 = arith.constant 0 : index
    %0 = vector.load %arg1[%c0, %c0_0, %c0_1] : memref<1x16x342xbf16, #tpu.memory_space<vmem>>, vector<1x16x342xbf16>
    %1 = vector.shape_cast %0 : vector<1x16x342xbf16> to vector<16x342xbf16>
    %2 = vector.extract_strided_slice %1 {offsets = [0, 0], sizes = [16, 288], strides = [1, 1]} : vector<16x342xbf16> to vector<16x288xbf16>
    %3 = vector.extract_strided_slice %1 {offsets = [0, 1], sizes = [16, 288], strides = [1, 1]} : vector<16x342xbf16> to vector<16x288xbf16>
    %4 = vector.extract_strided_slice %1 {offsets = [0, 2], sizes = [16, 288], strides = [1, 1]} : vector<16x342xbf16> to vector<16x288xbf16>
    %5 = vector.extract_strided_slice %1 {offsets = [0, 18], sizes = [16, 288], strides = [1, 1]} : vector<16x342xbf16> to vector<16x288xbf16>
    %6 = vector.extract_strided_slice %1 {offsets = [0, 19], sizes = [16, 288], strides = [1, 1]} : vector<16x342xbf16> to vector<16x288xbf16>
    %7 = vector.extract_strided_slice %1 {offsets = [0, 20], sizes = [16, 288], strides = [1, 1]} : vector<16x342xbf16> to vector<16x288xbf16>
    %8 = vector.extract_strided_slice %1 {offsets = [0, 36], sizes = [16, 288], strides = [1, 1]} : vector<16x342xbf16> to vector<16x288xbf16>
    %9 = vector.extract_strided_slice %1 {offsets = [0, 37], sizes = [16, 288], strides = [1, 1]} : vector<16x342xbf16> to vector<16x288xbf16>
    %10 = vector.extract_strided_slice %1 {offsets = [0, 38], sizes = [16, 288], strides = [1, 1]} : vector<16x342xbf16> to vector<16x288xbf16>
    %11 = tpu.concatenate %2, %3, %4, %5, %6, %7, %8, %9, %10 in 0 : vector<16x288xbf16>, vector<16x288xbf16>, vector<16x288xbf16>, vector<16x288xbf16>, vector<16x288xbf16>, vector<16x288xbf16>, vector<16x288xbf16>, vector<16x288xbf16>, vector<16x288xbf16> -> vector<144x288xbf16>
    %c0_2 = arith.constant 0 : index
    %c0_3 = arith.constant 0 : index
    %12 = vector.load %arg3[%c0_2, %c0_3] : memref<32x144xbf16, #tpu.memory_space<vmem>>, vector<32x144xbf16>
    %cst = arith.constant dense<0.000000e+00> : vector<32x288xf32>
    %13 = tpu.matmul %12, %11, %cst {dimension_numbers = #tpu.dot_dimension_numbers<[1], [0], [0], [1], [0, 0, 1, 1], [], []>} : vector<32x144xbf16>, vector<144x288xbf16>, vector<32x288xf32> -> vector<32x288xf32>
    %c0_4 = arith.constant 0 : index
    %c0_5 = arith.constant 0 : index
    %14 = vector.load %arg5[%c0_4, %c0_5] : memref<32x1xf32, #tpu.memory_space<vmem>>, vector<32x1xf32>
    %15 = vector.broadcast %14 : vector<32x1xf32> to vector<32x288xf32>
    %16 = arith.addf %13, %15 : vector<32x288xf32>
    %17 = vector.extract_strided_slice %16 {offsets = [0, 0], sizes = [16, 288], strides = [1, 1]} : vector<32x288xf32> to vector<16x288xf32>
    %cst_6 = arith.constant 0.000000e+00 : f32
    %18 = vector.broadcast %cst_6 : f32 to vector<16x288xf32>
    %19 = arith.maximumf %17, %18 : vector<16x288xf32>
    %20 = vector.extract_strided_slice %16 {offsets = [16, 0], sizes = [16, 288], strides = [1, 1]} : vector<32x288xf32> to vector<16x288xf32>
    %cst_7 = arith.constant 0.000000e+00 : f32
    %21 = vector.broadcast %cst_7 : f32 to vector<16x288xf32>
    %22 = arith.maximumf %20, %21 : vector<16x288xf32>
    %23 = arith.truncf %22 : vector<16x288xf32> to vector<16x288xbf16>
    %c0_8 = arith.constant 0 : index
    %c0_9 = arith.constant 0 : index
    %24 = vector.load %arg2[%c0_8, %c0_9] : memref<1x288xbf16, #tpu.memory_space<vmem>>, vector<1x288xbf16>
    %25 = vector.broadcast %24 : vector<1x288xbf16> to vector<16x288xbf16>
    %26 = arith.mulf %23, %25 : vector<16x288xbf16>
    %cst_10 = arith.constant 0.000000e+00 : bf16
    %27 = vector.broadcast %cst_10 : bf16 to vector<16x128xbf16>
    %c0_11 = arith.constant 0 : index
    %c0_12 = arith.constant 0 : index
    %28 = vector.load %arg9[%c0_11, %c0_12] : memref<16x512xbf16, #tpu.memory_space<vmem>>, vector<16x128xbf16>
    tpu.vector_store %arg9[%c0_11, %c0_12], %27 {strides = array<i32>} : memref<16x512xbf16, #tpu.memory_space<vmem>>, vector<16x128xbf16>,
    %cst_13 = arith.constant 0.000000e+00 : bf16
    %29 = vector.broadcast %cst_13 : bf16 to vector<16x96xbf16>
    %c0_14 = arith.constant 0 : index
    %c416 = arith.constant 416 : index
    %30 = vector.load %arg9[%c0_14, %c416] : memref<16x512xbf16, #tpu.memory_space<vmem>>, vector<16x96xbf16>
    tpu.vector_store %arg9[%c0_14, %c416], %29 {strides = array<i32>} : memref<16x512xbf16, #tpu.memory_space<vmem>>, vector<16x96xbf16>,
    %c0_15 = arith.constant 0 : index
    %c128 = arith.constant 128 : index
    %31 = vector.load %arg9[%c0_15, %c128] : memref<16x512xbf16, #tpu.memory_space<vmem>>, vector<16x288xbf16>
    tpu.vector_store %arg9[%c0_15, %c128], %26 {strides = array<i32>} : memref<16x512xbf16, #tpu.memory_space<vmem>>, vector<16x288xbf16>,
    %c0_16 = arith.constant 0 : index
    %c109 = arith.constant 109 : index
    %32 = vector.load %arg9[%c0_16, %c109] : memref<16x512xbf16, #tpu.memory_space<vmem>>, vector<16x288xbf16>
    %c0_17 = arith.constant 0 : index
    %c110 = arith.constant 110 : index
    %33 = vector.load %arg9[%c0_17, %c110] : memref<16x512xbf16, #tpu.memory_space<vmem>>, vector<16x288xbf16>
    %c0_18 = arith.constant 0 : index
    %c111 = arith.constant 111 : index
    %34 = vector.load %arg9[%c0_18, %c111] : memref<16x512xbf16, #tpu.memory_space<vmem>>, vector<16x288xbf16>
    %c0_19 = arith.constant 0 : index
    %c127 = arith.constant 127 : index
    %35 = vector.load %arg9[%c0_19, %c127] : memref<16x512xbf16, #tpu.memory_space<vmem>>, vector<16x288xbf16>
    %c0_20 = arith.constant 0 : index
    %c128_21 = arith.constant 128 : index
    %36 = vector.load %arg9[%c0_20, %c128_21] : memref<16x512xbf16, #tpu.memory_space<vmem>>, vector<16x288xbf16>
    %c0_22 = arith.constant 0 : index
    %c129 = arith.constant 129 : index
    %37 = vector.load %arg9[%c0_22, %c129] : memref<16x512xbf16, #tpu.memory_space<vmem>>, vector<16x288xbf16>
    %c0_23 = arith.constant 0 : index
    %c145 = arith.constant 145 : index
    %38 = vector.load %arg9[%c0_23, %c145] : memref<16x512xbf16, #tpu.memory_space<vmem>>, vector<16x288xbf16>
    %c0_24 = arith.constant 0 : index
    %c146 = arith.constant 146 : index
    %39 = vector.load %arg9[%c0_24, %c146] : memref<16x512xbf16, #tpu.memory_space<vmem>>, vector<16x288xbf16>
    %c0_25 = arith.constant 0 : index
    %c147 = arith.constant 147 : index
    %40 = vector.load %arg9[%c0_25, %c147] : memref<16x512xbf16, #tpu.memory_space<vmem>>, vector<16x288xbf16>
    %41 = tpu.concatenate %32, %33, %34, %35, %36, %37, %38, %39, %40 in 0 : vector<16x288xbf16>, vector<16x288xbf16>, vector<16x288xbf16>, vector<16x288xbf16>, vector<16x288xbf16>, vector<16x288xbf16>, vector<16x288xbf16>, vector<16x288xbf16>, vector<16x288xbf16> -> vector<144x288xbf16>
    %c0_26 = arith.constant 0 : index
    %c0_27 = arith.constant 0 : index
    %42 = vector.load %arg4[%c0_26, %c0_27] : memref<16x144xbf16, #tpu.memory_space<vmem>>, vector<16x144xbf16>
    %cst_28 = arith.constant dense<0.000000e+00> : vector<16x288xf32>
    %43 = tpu.matmul %42, %41, %cst_28 {dimension_numbers = #tpu.dot_dimension_numbers<[1], [0], [0], [1], [0, 0, 1, 1], [], []>} : vector<16x144xbf16>, vector<144x288xbf16>, vector<16x288xf32> -> vector<16x288xf32>
    %c0_29 = arith.constant 0 : index
    %c0_30 = arith.constant 0 : index
    %44 = vector.load %arg6[%c0_29, %c0_30] : memref<16x1xf32, #tpu.memory_space<vmem>>, vector<16x1xf32>
    %45 = vector.broadcast %44 : vector<16x1xf32> to vector<16x288xf32>
    %46 = arith.addf %43, %45 : vector<16x288xf32>
    %cst_31 = arith.constant 0.000000e+00 : f32
    %47 = vector.broadcast %cst_31 : f32 to vector<16x288xf32>
    %48 = arith.subf %47, %46 : vector<16x288xf32>
    %49 = math.exp %48 : vector<16x288xf32>
    %cst_32 = arith.constant 1.000000e+00 : f32
    %50 = vector.broadcast %cst_32 : f32 to vector<16x288xf32>
    %51 = arith.addf %50, %49 : vector<16x288xf32>
    %52 = tpu.reciprocal %51 {approx = true} : vector<16x288xf32> -> vector<16x288xf32>
    %c0_33 = arith.constant 0 : index
    %53 = memref.load %arg7[%c0_33] : memref<1xf32, #tpu.memory_space<smem>>
    %54 = vector.broadcast %53 : f32 to vector<16x288xf32>
    %55 = arith.mulf %54, %52 : vector<16x288xf32>
    %cst_34 = arith.constant 1.000000e+00 : f32
    %56 = vector.broadcast %cst_34 : f32 to vector<16x288xf32>
    %57 = arith.subf %56, %55 : vector<16x288xf32>
    %58 = arith.mulf %19, %57 : vector<16x288xf32>
    %c0_35 = arith.constant 0 : index
    %c0_36 = arith.constant 0 : index
    %c0_37 = arith.constant 0 : index
    %59 = vector.load %arg8[%c0_35, %c0_36, %c0_37] : memref<1x16x288xf32, #tpu.memory_space<vmem>>, vector<1x16x288xf32>
    %60 = vector.shape_cast %59 : vector<1x16x288xf32> to vector<16x288xf32>
    %61 = vector.shape_cast %58 : vector<16x288xf32> to vector<1x16x288xf32>
    tpu.vector_store %arg8[%c0_35, %c0_36, %c0_37], %61 {strides = array<i32>} : memref<1x16x288xf32, #tpu.memory_space<vmem>>, vector<1x16x288xf32>,
    return
  }
  func.func @transform_0(%arg0: i32) -> (i32, i32, i32) {
    %c0_i32 = arith.constant 0 : i32
    %c0_i32_0 = arith.constant 0 : i32
    %c0_i32_1 = arith.constant 0 : i32
    return %arg0, %c0_i32, %c0_i32_0 : i32, i32, i32
  }
  func.func @transform_1(%arg0: i32) -> (i32, i32) {
    %c0_i32 = arith.constant 0 : i32
    %c0_i32_0 = arith.constant 0 : i32
    %c0_i32_1 = arith.constant 0 : i32
    return %c0_i32, %c0_i32_0 : i32, i32
  }
  func.func @transform_2(%arg0: i32) -> (i32, i32) {
    %c0_i32 = arith.constant 0 : i32
    %c0_i32_0 = arith.constant 0 : i32
    %c0_i32_1 = arith.constant 0 : i32
    return %c0_i32, %c0_i32_0 : i32, i32
  }
  func.func @transform_3(%arg0: i32) -> (i32, i32) {
    %c0_i32 = arith.constant 0 : i32
    %c0_i32_0 = arith.constant 0 : i32
    %c0_i32_1 = arith.constant 0 : i32
    return %c0_i32, %c0_i32_0 : i32, i32
  }
  func.func @transform_4(%arg0: i32) -> (i32, i32) {
    %c0_i32 = arith.constant 0 : i32
    %c0_i32_0 = arith.constant 0 : i32
    %c0_i32_1 = arith.constant 0 : i32
    return %c0_i32, %c0_i32_0 : i32, i32
  }
  func.func @transform_5(%arg0: i32) -> (i32, i32) {
    %c0_i32 = arith.constant 0 : i32
    %c0_i32_0 = arith.constant 0 : i32
    %c0_i32_1 = arith.constant 0 : i32
    return %c0_i32, %c0_i32_0 : i32, i32
  }
  func.func @transform_6(%arg0: i32) -> i32 {
    %c0_i32 = arith.constant 0 : i32
    %c0_i32_0 = arith.constant 0 : i32
    return %c0_i32 : i32
  }
  func.func @transform_7(%arg0: i32) -> (i32, i32, i32) {
    %c0_i32 = arith.constant 0 : i32
    %c0_i32_0 = arith.constant 0 : i32
    %c0_i32_1 = arith.constant 0 : i32
    return %arg0, %c0_i32, %c0_i32_0 : i32, i32, i32
  }
}

</mosaic_0001>

<bundles_post_ra>
// kernel: scale_decoupling_forward.1
= control target key start
LH: loop header
LB: loop body
LE: loop exit
PB: predicated region body
PF: predicated region fallthrough
CT: control target
= control target key end

     0   :  { %s1199_s26 = smov 0   ;;  %s1487_s0 = inlined_call_operand.vmem [shape: bf16[2,16,342], index: 0, kind: input, shape index: {}]   ;;  %s1488_s1 = inlined_call_operand.vmem [shape: bf16[1,288], index: 1, kind: input, shape index: {}]   ;;  %s1489_s2 = inlined_call_operand.vmem [shape: bf16[32,144], index: 2, kind: input, shape index: {}]   ;;  %s1490_s3 = inlined_call_operand.vmem [shape: bf16[16,144], index: 3, kind: input, shape index: {}]   ;;  %s1491_s4 = inlined_call_operand.vmem [shape: f32[32,1], index: 4, kind: input, shape index: {}]   ;;  %s1492_s5 = inlined_call_operand.vmem [shape: f32[16,1], index: 5, kind: input, shape index: {}]   ;;  %s1493_s6 = inlined_call_operand.<no memory space> [shape: f32[1], index: 6, kind: input, shape index: {}]   ;;  %s1494_s7 = inlined_call_operand.vmem [shape: f32[2,16,288], index: 7, kind: output, shape index: {}]  }
   0x1   :  { %12 = sst [smem:[#allocation3]] %s1493_s6 }
   0x2 LB: > { %s1052_s27 = sadd.s32 4294967295, %s1143_s26   ;;  %p1056_p0 = scmp.ge.s32.totalorder %s1143_s26, 1  ;;  %s1143_s26 = sphi %s1199_s26, %s18_s26  }
   0x3   : > { %p238_p1 = scmp.lt.s32.totalorder %s1143_s26, 3 }
   0x5   : > { %p239_p2 = pnand %p1056_p0, %p238_p1 }
   0x6   : > { %p270_p3 = scmp.lt.s32.totalorder (!%p239_p2), %s1052_s27, 1  ;;  %v1145_v0 = vmov (!%p239_p2), 0   ;;  %s1146_s8 = smov (!%p239_p2), 127   ;;  %v1106_v4 = vld [vmem:[%s1489_s2 + $0x4] ss:$8 sps:$4 sm:$0xff] (!%p239_p2)   ;;  %vm443_vm0 = vcmask (!%p239_p2), 130048   ;;  %v580_v52 = vlaneseq (!%p239_p2) }
   0x7   : > { %242 = sbr.rel (%p239_p2) target bundleno = 1001 (0x3e9), region = 48  ;;  %503 = vmatprep.subr.bf16.mxu1 (!%p239_p2), %v1145_v0  ;;  %1098 = vset.pattern.permute.xlu0 (!%p239_p2), %v1145_v0  ;;  %s1147_s9 = smov (!%p239_p2), 126   ;;  %v403_v5 = vld [vmem:[%s1491_s4 + $0x10] sm:$0xff] (!%p239_p2)  ;;  %v404_v6 = vld [vmem:[%s1491_s4 + $0x18] sm:$0xff] (!%p239_p2)  ;;  %vm307_vm1 = vcmask (!%p239_p2), 1039360   ;;  %vm319_vm2 = vcmask (!%p239_p2), 1031168  }
   0x8   : > { %1099 = vset.pattern.permute.xlu1 (!%p239_p2), %v1145_v0  ;;  %s1148_s10 = smov (!%p239_p2), 110   ;;  %s1149_s11 = smov (!%p239_p2), 109   ;;  %1068 = vmatprep.mubr.msk.bf16.mxu1 (!%p239_p2), %vm443_vm0, %v1106_v4  ;;  %vm331_vm3 = vcmask (!%p239_p2), 900096   ;;  %vm343_vm4 = vcmask (!%p239_p2), 891904   ;;  %vm355_vm5 = vcmask (!%p239_p2), 883712   ;;  %vm367_vm6 = vcmask (!%p239_p2), 752640  }
   0x9   : > { %s1150_s12 = smov (!%p239_p2), 108   ;;  %s1151_s13 = smov (!%p239_p2), 92   ;;  %1066 = vmatprep.mubr.msk.bf16.mxu0 (!%p239_p2), %vm443_vm0, %v1106_v4  ;;  %vm379_vm7 = vcmask (!%p239_p2), 744448   ;;  %vm391_vm8 = vcmask (!%p239_p2), 736256   ;;  %v1104_v44 = vld [vmem:[%s1489_s2] ss:$8 sps:$4 sm:$0xff] (!%p239_p2)  }
   0xa   : > { %s1152_s16 = smov (!%p239_p2), 91   ;;  %s1153_s17 = smov (!%p239_p2), 90   ;;  %v1107_v47 = vld [vmem:[%s1489_s2 + $0x14] ss:$8 sps:$4 sm:$0xff] (!%p239_p2)   ;;  %v1109_v49 = vld [vmem:[%s1489_s2 + $0x10] ss:$8 sps:$4 sm:$0xff] (!%p239_p2)  }
   0xb   : > { %vm617_vm9 = vcmask (!%p239_p2), 1047808   ;;  %v1154_v50 = vmov (!%p239_p2), 1966171168   ;;  %v581_v54 = vshrl.u32 (!%p239_p2), %v580_v52, 7  ;;  %vm621_vm10 = vcmask (!%p239_p2), 261120   ;;  %s1155_s14 = smov (!%p239_p2), 19  }
   0xc   : > { %618 = vst.msk [vmem:[#allocation2 + $0x18] sm:$0xff] (!%p239_p2), %vm617_vm9, %v1145_v0  ;;  %v578_v51 = vunpack.c.l.s4 (!%p239_p2), %v1154_v50  ;;  %v1070_v56 = vld.sshfl [vmem:[%s1488_s1] sm:$0x13 pattern:$0x75316420] (!%p239_p2)  ;;  %vm799_vm11 = vcmask (!%p239_p2), 154624  }
   0xd   : > { %s971_s21 = sld [smem:[#allocation3]] (!%p239_p2) }
   0xe   : > { %s1496_s27 = smov (!%p270_p3, %s1052_s27), 1  ;;  %v579_v53 = vunpack.c.0.s8 %v578_v51 }
   0xf   : > { %s1077_s6 = smul.u32 24, %s1496_s27 }
  0x10   : > { %v582_v55 = vsub.s32 %v579_v53, %v581_v54  ;;  %s1078_s22 = smul.u32 48, %s1496_s27 }
  0x11   : > { %s274_s30 = scalar_lea.vmem %s1487_s0, %s1077_s6 }
  0x12   : > { %v1100_v1 = vld [vmem:[%s274_s30 + $0x4] ss:$12 sps:$4 sm:$0xff]   ;;  %v1102_v2 = vld [vmem:[%s274_s30] ss:$12 sps:$4 sm:$0xff]   ;;  %v1103_v3 = vld [vmem:[%s274_s30 + $0x8] ss:$12 sps:$4 sm:$0xff]   ;;  %v583_v59 = vrot.slane %v1070_v56, %v582_v55  ;;  %s1466_s25 = scalar_lea.vmem %s1494_s7, %s1078_s22 }
  0x13   : > { %303 = vrot.lane.b32.xlu0 %v1100_v1, %s1146_s8  ;;  %450 = vmatprep.subr.bf16.mxu0 %v1100_v1 }
  0x14   : > { %301 = vrot.lane.b32.xlu1 %v1102_v2, %s1146_s8  ;;  %451 = vmatpush1.bf16.msra.mxu0 %v1102_v2  ;;  %v591_v4 = vcombine.high %v583_v59, %v583_v59 }
  0x15   : > { %504 = vmatpush1.bf16.msra.mxu1 %v1103_v3 }
  0x16   : > { %505 = vmatprep.subr.bf16.mxu1 %v1145_v0 }
  0x17   : > { %305 = vrot.lane.b32.xlu0 %v1103_v3, %s1146_s8 }
  0x18   : > { %315 = vrot.lane.b32.xlu1 %v1100_v1, %s1147_s9 }
  0x1b   : > { %317 = vrot.lane.b32.xlu0 %v1103_v3, %s1147_s9 }
  0x1c   : > { %313 = vrot.lane.b32.xlu1 %v1102_v2, %s1147_s9 }
  0x1f   : > { %327 = vrot.lane.b32.xlu0 %v1100_v1, %s1148_s10 }
  0x20   : > { %329 = vrot.lane.b32.xlu1 %v1103_v3, %s1148_s10 }
  0x23   : > { %325 = vrot.lane.b32.xlu0 %v1102_v2, %s1148_s10 }
  0x24   : > { %339 = vrot.lane.b32.xlu1 %v1100_v1, %s1149_s11 }
  0x27   : > { %341 = vrot.lane.b32.xlu0 %v1103_v3, %s1149_s11 }
  0x28   : > { %337 = vrot.lane.b32.xlu1 %v1102_v2, %s1149_s11 }
  0x2b   : > { %351 = vrot.lane.b32.xlu0 %v1100_v1, %s1150_s12 }
  0x2c   : > { %353 = vrot.lane.b32.xlu1 %v1103_v3, %s1150_s12 }
  0x2f   : > { %349 = vrot.lane.b32.xlu0 %v1102_v2, %s1150_s12 }
  0x30   : > { %363 = vrot.lane.b32.xlu1 %v1100_v1, %s1151_s13 }
  0x33   : > { %365 = vrot.lane.b32.xlu0 %v1103_v3, %s1151_s13 }
  0x34   : > { %361 = vrot.lane.b32.xlu1 %v1102_v2, %s1151_s13 }
  0x37   : > { %375 = vrot.lane.b32.xlu0 %v1100_v1, %s1152_s16 }
  0x38   : > { %377 = vrot.lane.b32.xlu1 %v1103_v3, %s1152_s16 }
  0x3b   : > { %373 = vrot.lane.b32.xlu0 %v1102_v2, %s1152_s16 }
  0x3c   : > { %387 = vrot.lane.b32.xlu1 %v1100_v1, %s1153_s17 }
  0x3f   : > { %389 = vrot.lane.b32.xlu0 %v1103_v3, %s1153_s17 }
  0x40   : > { %385 = vrot.lane.b32.xlu1 %v1102_v2, %s1153_s17  ;;  %v576_v2 = vcombine.high %v1070_v56, %v1070_v56 }
  0x43   : > { %417 = vperm.xlu0 %1098, %v403_v5  }
  0x44   : > { %422 = vperm.xlu1 %1099, %v404_v6  }
  0x47   : > { %631 = vrot.lane.b32.xlu0 %v1145_v0, %s1146_s8 }
  0x4b   : > { %642 = vrot.lane.b32.xlu0 %v1145_v0, %s1147_s9 }
  0x4f   : > { %653 = vrot.lane.b32.xlu0 %v1145_v0, %s1148_s10 }
  0x85   : > { %v304_v7 = vpop.permute.xlu0 %303 }
  0x86   : > { %v302_v8 = vpop.permute.xlu1 %301 }
  0x87   : > { %v308_v12 = vsel %vm307_vm1, %v302_v8, %v304_v7  ;;  %v590_v8 = vrot.slane %v576_v2, %v582_v55 }
  0x89   : > { %v306_v9 = vpop.permute.xlu0 %305 }
  0x8a   : > { %v316_v10 = vpop.permute.xlu1 %315  ;;  %506 = vmatpush1.bf16.msra.mxu1 %v306_v9  ;;  %v309_v11 = vsel %vm307_vm1, %v304_v7, %v306_v9 }
  0x8b   : > { %452 = vmatprep.subr.bf16.mxu0 %v309_v11  ;;  %507 = vmatprep.subr.bf16.mxu1 %v1145_v0  ;;  %v597_v11 = vsub.s32 0, %v581_v54 }
  0x8c   : > { %453 = vmatpush1.bf16.msra.mxu0 %v308_v12  ;;  %v607_v12 = vpack.i.b16 %v591_v4, %v591_v4 }
  0x8d   : > { %v318_v13 = vpop.permute.xlu0 %317 }
  0x8e   : > { %v314_v14 = vpop.permute.xlu1 %313  ;;  %508 = vmatpush1.bf16.msra.mxu1 %v318_v13  ;;  %v321_v15 = vsel %vm319_vm2, %v316_v10, %v318_v13 }
  0x8f   : > { %454 = vmatprep.subr.bf16.mxu0 %v321_v15  ;;  %v320_v16 = vsel %vm319_vm2, %v314_v14, %v316_v10  ;;  %509 = vmatprep.subr.bf16.mxu1 %v1145_v0 }
  0x90   : > { %455 = vmatpush1.bf16.msra.mxu0 %v320_v16 }
  0x91   : > { %v328_v17 = vpop.permute.xlu0 %327 }
  0x92   : > { %v330_v18 = vpop.permute.xlu1 %329 }
  0x93   : > { %v333_v19 = vsel %vm331_vm3, %v328_v17, %v330_v18  ;;  %510 = vmatpush1.bf16.msra.mxu1 %v330_v18 }
  0x94   : > { %456 = vmatprep.subr.bf16.mxu0 %v333_v19  ;;  %511 = vmatprep.subr.bf16.mxu1 %v1145_v0  ;;  %v593_v19 = vpack.i.b16 %v583_v59, %v583_v59 }
  0x95   : > { %v326_v20 = vpop.permute.xlu0 %325 }
  0x96   : > { %v340_v21 = vpop.permute.xlu1 %339  ;;  %v332_v22 = vsel %vm331_vm3, %v326_v20, %v328_v17 }
  0x97   : > { %457 = vmatpush1.bf16.msra.mxu0 %v332_v22  ;;  %v600_v22 = vpack.i.b16 %v590_v8, %v590_v8 }
  0x99   : > { %v342_v23 = vpop.permute.xlu0 %341 }
  0x9a   : > { %v338_v24 = vpop.permute.xlu1 %337  ;;  %512 = vmatpush1.bf16.msra.mxu1 %v342_v23  ;;  %v345_v25 = vsel %vm343_vm4, %v340_v21, %v342_v23 }
  0x9b   : > { %458 = vmatprep.subr.bf16.mxu0 %v345_v25  ;;  %v344_v26 = vsel %vm343_vm4, %v338_v24, %v340_v21  ;;  %513 = vmatprep.subr.bf16.mxu1 %v1145_v0  ;;  %v612_v24 = vrot.slane %v607_v12, %v597_v11 }
  0x9c   : > { %459 = vmatpush1.bf16.msra.mxu0 %v344_v26 }
  0x9d   : > { %v352_v27 = vpop.permute.xlu0 %351 }
  0x9e   : > { %v354_v28 = vpop.permute.xlu1 %353 }
  0x9f   : > { %v357_v29 = vsel %vm355_vm5, %v352_v27, %v354_v28  ;;  %514 = vmatpush1.bf16.msra.mxu1 %v354_v28 }
  0xa0   : > { %460 = vmatprep.subr.bf16.mxu0 %v357_v29  ;;  %515 = vmatprep.subr.bf16.mxu1 %v1145_v0 }
  0xa1   : > { %v350_v30 = vpop.permute.xlu0 %349 }
  0xa2   : > { %v364_v31 = vpop.permute.xlu1 %363  ;;  %v356_v32 = vsel %vm355_vm5, %v350_v30, %v352_v27 }
  0xa3   : > { %461 = vmatpush1.bf16.msra.mxu0 %v356_v32  ;;  %v598_v32 = vrot.slane %v593_v19, %v597_v11 }
  0xa5   : > { %v366_v33 = vpop.permute.xlu0 %365 }
  0xa6   : > { %v362_v34 = vpop.permute.xlu1 %361  ;;  %516 = vmatpush1.bf16.msra.mxu1 %v366_v33  ;;  %v369_v35 = vsel %vm367_vm6, %v364_v31, %v366_v33 }
  0xa7   : > { %462 = vmatprep.subr.bf16.mxu0 %v369_v35  ;;  %v368_v36 = vsel %vm367_vm6, %v362_v34, %v364_v31  ;;  %517 = vmatprep.subr.bf16.mxu1 %v1145_v0  ;;  %v605_v35 = vrot.slane %v600_v22, %v597_v11 }
  0xa8   : > { %463 = vmatpush1.bf16.msra.mxu0 %v368_v36 }
  0xa9   : > { %v376_v37 = vpop.permute.xlu0 %375 }
  0xaa   : > { %v378_v38 = vpop.permute.xlu1 %377 }
  0xab   : > { %v381_v39 = vsel %vm379_vm7, %v376_v37, %v378_v38  ;;  %518 = vmatpush1.bf16.msra.mxu1 %v378_v38 }
  0xac   : > { %464 = vmatprep.subr.bf16.mxu0 %v381_v39  ;;  %519 = vmatprep.subr.bf16.mxu1 %v1145_v0 }
  0xad   : > { %v374_v40 = vpop.permute.xlu0 %373 }
  0xae   : > { %v388_v41 = vpop.permute.xlu1 %387  ;;  %v380_v42 = vsel %vm379_vm7, %v374_v40, %v376_v37 }
  0xaf   : > { %465 = vmatpush1.bf16.msra.mxu0 %v380_v42 }
  0xb1   : > { %v390_v43 = vpop.permute.xlu0 %389 }
  0xb2   : > { %520 = vmatpush1.bf16.msra.mxu1 %v390_v43  ;;  %v386_v45 = vpop.permute.xlu1 %385  ;;  %v393_v46 = vsel %vm391_vm8, %v388_v41, %v390_v43 }
  0xb3   : > { %466 = vmatprep.subr.bf16.mxu0 %v393_v46  ;;  %v392_v48 = vsel %vm391_vm8, %v386_v45, %v388_v41  ;;  %900 = vmatprep.subr.bf16.mxu1 %v1145_v0 }
  0xb4   : > { %467 = vmatpush1.bf16.msra.mxu0 %v392_v48 }
  0xb5   : > { %536 = vmatmul.mubr.bf16.vlgmr.msra.gmra.mrb[0].mxu1 %v1104_v44 }
  0xb6   : > { %1069 = vmatprep.mubr.msk.bf16.mxu1 %vm443_vm0, %v1107_v47 }
  0xb7   : > { %483 = vmatmul.mubr.bf16.vlgmr.msra.gmra.mrb[0].mxu0 %v1104_v44 }
  0xb8   : > { %1067 = vmatprep.mubr.msk.bf16.mxu0 %vm443_vm0, %v1107_v47 }
  0xbd   : > { %544 = vmatmul.mubr.bf16.gmra.mrb[4].mxu1 %v1109_v49 }
  0xbf   : > { %493 = vmatmul.mubr.bf16.gmra.mrb[4].mxu0 %v1109_v49 }
  0xc2   : > { %v418_v5 = vpop.permute.xlu0 %417 }
  0xc3   : > { %v423_v7 = vpop.permute.xlu1 %422 }
  0xc6   : > { %v632_v42 = vpop.permute.xlu0 %631 }
  0xca   : > { %v643_v43 = vpop.permute.xlu0 %642 }
  0xce   : > { %v1339_v44 = vpop.permute.xlu0 %653 }
 0x188   : > { %v1297_v57 = vpop.f32.mrb[0].mxu1 }
 0x189   : > { %v539_v58 = vpop.f32.mrb[1].mxu1 }
 0x18a   : > { %v1299_v60 = vpop.f32.mrb[2].mxu1  ;;  %v1301_v61 = vpop.f32.mrb[0].mxu0 }
 0x18b   : > { %v542_v62 = vpop.f32.mrb[3].mxu1  ;;  %v1303_v63 = vpop.f32.mrb[1].mxu0 }
 0x18c   : > { %v1305_v1 = vpop.f32.mrb[2].mxu0 }
 0x18d   : > { %v1307_v3 = vpop.f32.mrb[3].mxu0 }
 0x190   : > { %v545_v6 = vpop.f32.mrb[4].mxu1 }
 0x191   : > { %v546_v9 = vadd.f32 %v545_v6, %v418_v5  ;;  %v547_v10 = vpop.f32.mrb[5].mxu1 }
 0x192   : > { %v548_v13 = vpop.f32.mrb[6].mxu1  ;;  %v494_v14 = vpop.f32.mrb[4].mxu0 }
 0x193   : > { %v549_v15 = vadd.f32 %v548_v13, %v423_v7  ;;  %v495_v16 = vadd.f32 %v494_v14, %v418_v5  ;;  %v496_v17 = vpop.f32.mrb[5].mxu0  ;;  %v550_v18 = vpop.f32.mrb[7].mxu1  ;;  %v560_v23 = vmax.f32 %v546_v9, 0.0 }
 0x194   : > { %v497_v20 = vadd.f32 %v496_v17, %v418_v5  ;;  %v498_v21 = vpop.f32.mrb[6].mxu0 }
 0x195   : > { %v563_v25 = vmax.f32 %v549_v15, 0.0  ;;  %v499_v26 = vadd.f32 %v498_v21, %v423_v7  ;;  %v500_v27 = vpop.f32.mrb[7].mxu0  ;;  %v558_v30 = vmax.f32 %v495_v16, 0.0 }
 0x196   : > { %v501_v28 = vadd.f32 %v500_v27, %v423_v7  ;;  %v559_v33 = vmax.f32 %v497_v20, 0.0  ;;  %v1112_v20 = vld [vmem:[%s1490_s3 + $0x4] ss:$8 sps:$4 sm:$0xff]  }
 0x197   : > { %v566_v29 = vpack.c.bf16 %v563_v25, %v560_v23  ;;  %v561_v31 = vmax.f32 %v499_v26, 0.0  ;;  %1074 = vmatprep.mubr.msk.bf16.mxu1 %vm443_vm0, %v1112_v20  ;;  %1073 = vmatprep.mubr.msk.bf16.mxu0 %vm443_vm0, %v1112_v20  ;;  %v1110_v20 = vld [vmem:[%s1490_s3] ss:$8 sps:$4 sm:$0xff]  }
 0x198   : > { %v562_v34 = vmax.f32 %v501_v28, 0.0 }
 0x199   : > { %v615_v36 = vmul.bf16 %v612_v24, %v566_v29  ;;  %v564_v37 = vpack.c.bf16 %v561_v31, %v558_v30 }
 0x19a   : > { %v565_v38 = vpack.c.bf16 %v562_v34, %v559_v33  ;;  %v402_v34 = vld [vmem:[%s1491_s4 + $0x8] sm:$0xff] }
 0x19b   : > { %622 = vst.msk [vmem:[#allocation2 + $0x18] sm:$0xff] %vm621_vm10, %v615_v36  ;;  %v613_v39 = vmul.bf16 %v598_v32, %v564_v37  ;;  %v707_v32 = vld [vmem:[%s1492_s5 + $0x8] sm:$0xff] }
 0x19c   : > { %v614_v40 = vmul.bf16 %v605_v35, %v565_v38 }
 0x1a2   : > { %v626_v41 = vld [vmem:[#allocation2 + $0x18] sm:$0xff] }
 0x1a3   : > { %676 = vrot.lane.b32.xlu0 %v626_v41, %s1150_s12  ;;  %637 = vrot.lane.b32.xlu1 %v626_v41, %s1146_s8 }
 0x1a7   : > { %692 = vrot.lane.b32.xlu0 %v626_v41, %s1152_s16  ;;  %648 = vrot.lane.b32.xlu1 %v626_v41, %s1147_s9 }
 0x1ab   : > { %659 = vrot.lane.b32.xlu1 %v626_v41, %s1148_s10  ;;  %672 = vrot.lane.b32.xlu0 %v613_v39, %s1150_s12 }
 0x1af   : > { %668 = vrot.lane.b32.xlu1 %v626_v41, %s1149_s11  ;;  %688 = vrot.lane.b32.xlu0 %v613_v39, %s1152_s16 }
 0x1b3   : > { %684 = vrot.lane.b32.xlu1 %v626_v41, %s1151_s13  ;;  %729 = vrot.lane.b32.xlu0 %v613_v39, %s1155_s14 }
 0x1b7   : > { %700 = vrot.lane.b32.xlu1 %v626_v41, %s1153_s17  ;;  %635 = vrot.lane.b32.xlu0 %v614_v40, %s1146_s8 }
 0x1bb   : > { %646 = vrot.lane.b32.xlu0 %v614_v40, %s1147_s9  ;;  %633 = vrot.lane.b32.xlu1 %v613_v39, %s1146_s8 }
 0x1bf   : > { %657 = vrot.lane.b32.xlu0 %v614_v40, %s1148_s10  ;;  %644 = vrot.lane.b32.xlu1 %v613_v39, %s1147_s9 }
 0x1c3   : > { %666 = vrot.lane.b32.xlu0 %v614_v40, %s1149_s11  ;;  %655 = vrot.lane.b32.xlu1 %v613_v39, %s1148_s10 }
 0x1c7   : > { %727 = vrot.lane.b32.xlu0 %v1145_v0, %s1155_s14  ;;  %664 = vrot.lane.b32.xlu1 %v613_v39, %s1149_s11 }
 0x1cb   : > { %682 = vrot.lane.b32.xlu0 %v614_v40, %s1151_s13  ;;  %680 = vrot.lane.b32.xlu1 %v613_v39, %s1151_s13 }
 0x1cf   : > { %698 = vrot.lane.b32.xlu0 %v614_v40, %s1153_s17  ;;  %696 = vrot.lane.b32.xlu1 %v613_v39, %s1153_s17 }
 0x1d3   : > { %674 = vrot.lane.b32.xlu1 %v614_v40, %s1150_s12 }
 0x1d7   : > { %733 = vrot.lane.b32.xlu1 %v626_v41, %s1155_s14  ;;  %v706_v41 = vld [vmem:[%s1492_s5] sm:$0xff] }
 0x1db   : > { %690 = vrot.lane.b32.xlu1 %v614_v40, %s1152_s16 }
 0x1df   : > { %731 = vrot.lane.b32.xlu1 %v614_v40, %s1155_s14 }
 0x215   : > { %v677_v45 = vpop.permute.xlu0 %676  ;;  %v638_v46 = vpop.permute.xlu1 %637 }
 0x216   : > { %741 = vrot.lane.b32.xlu1 %v638_v46, %s1155_s14 }
 0x219   : > { %v693_v47 = vpop.permute.xlu0 %692  ;;  %v649_v48 = vpop.permute.xlu1 %648 }
 0x21a   : > { %749 = vrot.lane.b32.xlu1 %v649_v48, %s1155_s14 }
 0x21d   : > { %v660_v49 = vpop.permute.xlu1 %659  ;;  %v1343_v50 = vpop.permute.xlu0 %672 }
 0x21e   : > { %757 = vrot.lane.b32.xlu1 %v660_v49, %s1155_s14 }
 0x221   : > { %v669_v51 = vpop.permute.xlu1 %668  ;;  %v1346_v52 = vpop.permute.xlu0 %688 }
 0x222   : > { %765 = vrot.lane.b32.xlu1 %v669_v51, %s1155_s14 }
 0x225   : > { %v685_v53 = vpop.permute.xlu1 %684  ;;  %v730_v54 = vpop.permute.xlu0 %729 }
 0x226   : > { %773 = vrot.lane.b32.xlu1 %v677_v45, %s1155_s14 }
 0x229   : > { %v701_v55 = vpop.permute.xlu1 %700  ;;  %v636_v56 = vpop.permute.xlu0 %635 }
 0x22a   : > { %781 = vrot.lane.b32.xlu1 %v685_v53, %s1155_s14  ;;  %v641_v2 = vsel %vm307_vm1, %v636_v56, %v638_v46 }
 0x22d   : > { %v634_v58 = vpop.permute.xlu1 %633  ;;  %v647_v59 = vpop.permute.xlu0 %646 }
 0x22e   : > { %789 = vrot.lane.b32.xlu1 %v693_v47, %s1155_s14  ;;  %v652_v6 = vsel %vm319_vm2, %v647_v59, %v649_v48  ;;  %v639_v18 = vsel %vm307_vm1, %v632_v42, %v634_v58  ;;  %v640_v31 = vsel %vm307_vm1, %v634_v58, %v636_v56  ;;  %v401_v42 = vld [vmem:[%s1491_s4] sm:$0xff] }
 0x231   : > { %v645_v62 = vpop.permute.xlu1 %644  ;;  %v658_v4 = vpop.permute.xlu0 %657 }
 0x232   : > { %739 = vrot.lane.b32.xlu1 %v641_v2, %s1155_s14  ;;  %v663_v8 = vsel %vm331_vm3, %v658_v4, %v660_v49  ;;  %v650_v22 = vsel %vm319_vm2, %v643_v43, %v645_v62  ;;  %v651_v33 = vsel %vm319_vm2, %v645_v62, %v647_v59 }
 0x235   : > { %v656_v5 = vpop.permute.xlu1 %655  ;;  %v667_v9 = vpop.permute.xlu0 %666 }
 0x236   : > { %747 = vrot.lane.b32.xlu1 %v652_v6, %s1155_s14  ;;  %v671_v11 = vsel %vm343_vm4, %v667_v9, %v669_v51  ;;  %v661_v26 = vsel %vm331_vm3, %v1339_v44, %v656_v5  ;;  %v662_v35 = vsel %vm331_vm3, %v656_v5, %v658_v4 }
 0x239   : > { %v665_v7 = vpop.permute.xlu1 %664  ;;  %v728_v12 = vpop.permute.xlu0 %727 }
 0x23a   : > { %755 = vrot.lane.b32.xlu1 %v663_v8, %s1155_s14  ;;  %759 = vrot.lane.b32.xlu0 %v665_v7, %s1155_s14  ;;  %v800_v30 = vsel %vm799_vm11, %v728_v12, %v730_v54  ;;  %v670_v36 = vsel %vm343_vm4, %v665_v7, %v667_v9 }
 0x23d   : > { %v681_v10 = vpop.permute.xlu1 %680  ;;  %v683_v16 = vpop.permute.xlu0 %682 }
 0x23e   : > { %763 = vrot.lane.b32.xlu1 %v671_v11, %s1155_s14  ;;  %767 = vrot.lane.b32.xlu0 %v1343_v50, %s1155_s14  ;;  %v687_v19 = vsel %vm367_vm6, %v683_v16, %v685_v53  ;;  %v686_v38 = vsel %vm367_vm6, %v681_v10, %v683_v16 }
 0x241   : > { %v697_v13 = vpop.permute.xlu1 %696  ;;  %v699_v24 = vpop.permute.xlu0 %698 }
 0x242   : > { %775 = vrot.lane.b32.xlu0 %v681_v10, %s1155_s14  ;;  %v703_v28 = vsel %vm391_vm8, %v699_v24, %v701_v55  ;;  %v702_v40 = vsel %vm391_vm8, %v697_v13, %v699_v24 }
 0x245   : > { %v675_v14 = vpop.permute.xlu1 %674 }
 0x246   : > { %783 = vrot.lane.b32.xlu0 %v1346_v52, %s1155_s14  ;;  %v679_v15 = vsel %vm355_vm5, %v675_v14, %v677_v45  ;;  %v678_v37 = vsel %vm355_vm5, %v1343_v50, %v675_v14 }
 0x247   : > { %771 = vrot.lane.b32.xlu1 %v679_v15, %s1155_s14 }
 0x249   : > { %v734_v17 = vpop.permute.xlu1 %733 }
 0x24a   : > { %735 = vrot.lane.b32.xlu0 %v639_v18, %s1155_s14 }
 0x24b   : > { %779 = vrot.lane.b32.xlu1 %v687_v19, %s1155_s14 }
 0x24d   : > { %v691_v21 = vpop.permute.xlu1 %690 }
 0x24e   : > { %743 = vrot.lane.b32.xlu0 %v650_v22, %s1155_s14  ;;  %v695_v23 = vsel %vm379_vm7, %v691_v21, %v693_v47  ;;  %v694_v39 = vsel %vm379_vm7, %v1346_v52, %v691_v21 }
 0x24f   : > { %787 = vrot.lane.b32.xlu1 %v695_v23, %s1155_s14 }
 0x251   : > { %v732_v25 = vpop.permute.xlu1 %731 }
 0x252   : > { %v802_v27 = vsel %vm799_vm11, %v732_v25, %v734_v17  ;;  %751 = vrot.lane.b32.xlu0 %v661_v26, %s1155_s14  ;;  %v801_v29 = vsel %vm799_vm11, %v730_v54, %v732_v25 }
 0x253   : > { %795 = vrot.lane.b32.xlu1 %v703_v28, %s1155_s14  ;;  %857 = vmatprep.subr.bf16.mxu0 %v801_v29 }
 0x254   : > { %901 = vmatpush1.bf16.msra.mxu1 %v802_v27  ;;  %858 = vmatpush1.bf16.msra.mxu0 %v800_v30 }
 0x255   : > { %902 = vmatprep.subr.bf16.mxu1 %v1145_v0 }
 0x256   : > { %737 = vrot.lane.b32.xlu0 %v640_v31, %s1155_s14 }
 0x257   : > { %797 = vrot.lane.b32.xlu1 %v701_v55, %s1155_s14 }
 0x25a   : > { %745 = vrot.lane.b32.xlu0 %v651_v33, %s1155_s14 }
 0x25b   : > { %715 = vperm.xlu1 %1099, %v707_v32  }
 0x25e   : > { %753 = vrot.lane.b32.xlu0 %v662_v35, %s1155_s14 }
 0x25f   : > { %412 = vperm.xlu1 %1099, %v402_v34  }
 0x262   : > { %761 = vrot.lane.b32.xlu0 %v670_v36, %s1155_s14 }
 0x266   : > { %769 = vrot.lane.b32.xlu0 %v678_v37, %s1155_s14 }
 0x26a   : > { %777 = vrot.lane.b32.xlu0 %v686_v38, %s1155_s14 }
 0x26e   : > { %785 = vrot.lane.b32.xlu0 %v694_v39, %s1155_s14 }
 0x272   : > { %793 = vrot.lane.b32.xlu0 %v702_v40, %s1155_s14 }
 0x276   : > { %791 = vrot.lane.b32.xlu0 %v697_v13, %s1155_s14 }
 0x27a   : > { %710 = vperm.xlu0 %1098, %v706_v41  }
 0x27e   : > { %407 = vperm.xlu0 %1098, %v401_v42  }
 0x288   : > { %v742_v43 = vpop.permute.xlu1 %741 }
 0x28c   : > { %v750_v44 = vpop.permute.xlu1 %749 }
 0x290   : > { %v758_v45 = vpop.permute.xlu1 %757 }
 0x294   : > { %v766_v46 = vpop.permute.xlu1 %765 }
 0x298   : > { %v774_v47 = vpop.permute.xlu1 %773 }
 0x29c   : > { %v782_v48 = vpop.permute.xlu1 %781 }
 0x2a0   : > { %v790_v49 = vpop.permute.xlu1 %789 }
 0x2a4   : > { %v740_v50 = vpop.permute.xlu1 %739 }
 0x2a5   : > { %v805_v51 = vsel %vm799_vm11, %v740_v50, %v742_v43 }
 0x2a6   : > { %903 = vmatpush1.bf16.msra.mxu1 %v805_v51 }
 0x2a7   : > { %904 = vmatprep.subr.bf16.mxu1 %v1145_v0 }
 0x2a8   : > { %v748_v52 = vpop.permute.xlu1 %747 }
 0x2a9   : > { %v808_v53 = vsel %vm799_vm11, %v748_v52, %v750_v44 }
 0x2aa   : > { %905 = vmatpush1.bf16.msra.mxu1 %v808_v53 }
 0x2ab   : > { %906 = vmatprep.subr.bf16.mxu1 %v1145_v0 }
 0x2ac   : > { %v760_v54 = vpop.permute.xlu0 %759  ;;  %v756_v55 = vpop.permute.xlu1 %755 }
 0x2ad   : > { %v811_v56 = vsel %vm799_vm11, %v756_v55, %v758_v45 }
 0x2ae   : > { %907 = vmatpush1.bf16.msra.mxu1 %v811_v56 }
 0x2af   : > { %908 = vmatprep.subr.bf16.mxu1 %v1145_v0 }
 0x2b0   : > { %v768_v58 = vpop.permute.xlu0 %767  ;;  %v764_v59 = vpop.permute.xlu1 %763 }
 0x2b1   : > { %v814_v62 = vsel %vm799_vm11, %v764_v59, %v766_v46 }
 0x2b2   : > { %909 = vmatpush1.bf16.msra.mxu1 %v814_v62 }
 0x2b3   : > { %910 = vmatprep.subr.bf16.mxu1 %v1145_v0 }
 0x2b4   : > { %v776_v2 = vpop.permute.xlu0 %775 }
 0x2b8   : > { %v784_v4 = vpop.permute.xlu0 %783 }
 0x2b9   : > { %v772_v5 = vpop.permute.xlu1 %771 }
 0x2ba   : > { %v817_v6 = vsel %vm799_vm11, %v772_v5, %v774_v47 }
 0x2bb   : > { %911 = vmatpush1.bf16.msra.mxu1 %v817_v6 }
 0x2bc   : > { %v736_v7 = vpop.permute.xlu0 %735  ;;  %912 = vmatprep.subr.bf16.mxu1 %v1145_v0 }
 0x2bd   : > { %v780_v8 = vpop.permute.xlu1 %779 }
 0x2be   : > { %v820_v9 = vsel %vm799_vm11, %v780_v8, %v782_v48 }
 0x2bf   : > { %913 = vmatpush1.bf16.msra.mxu1 %v820_v9 }
 0x2c0   : > { %v744_v10 = vpop.permute.xlu0 %743  ;;  %914 = vmatprep.subr.bf16.mxu1 %v1145_v0 }
 0x2c1   : > { %v788_v11 = vpop.permute.xlu1 %787 }
 0x2c2   : > { %v823_v12 = vsel %vm799_vm11, %v788_v11, %v790_v49 }
 0x2c3   : > { %915 = vmatpush1.bf16.msra.mxu1 %v823_v12 }
 0x2c4   : > { %v752_v13 = vpop.permute.xlu0 %751  ;;  %916 = vmatprep.subr.bf16.mxu1 %v1145_v0 }
 0x2c5   : > { %v796_v14 = vpop.permute.xlu1 %795 }
 0x2c8   : > { %v738_v15 = vpop.permute.xlu0 %737 }
 0x2c9   : > { %v803_v16 = vsel %vm799_vm11, %v736_v7, %v738_v15  ;;  %v798_v17 = vpop.permute.xlu1 %797  ;;  %v804_v18 = vsel %vm799_vm11, %v738_v15, %v740_v50 }
 0x2ca   : > { %v826_v19 = vsel %vm799_vm11, %v796_v14, %v798_v17  ;;  %859 = vmatprep.subr.bf16.mxu0 %v804_v18 }
 0x2cb   : > { %860 = vmatpush1.bf16.msra.mxu0 %v803_v16  ;;  %917 = vmatpush1.bf16.msra.mxu1 %v826_v19 }
 0x2cc   : > { %v746_v21 = vpop.permute.xlu0 %745 }
 0x2cd   : > { %v806_v22 = vsel %vm799_vm11, %v744_v10, %v746_v21  ;;  %v807_v0 = vsel %vm799_vm11, %v746_v21, %v748_v52 }
 0x2ce   : > { %861 = vmatprep.subr.bf16.mxu0 %v807_v0  ;;  %933 = vmatmul.mubr.bf16.vlgmr.msra.gmra.mrb[8].mxu1 %v1110_v20 }
 0x2cf   : > { %862 = vmatpush1.bf16.msra.mxu0 %v806_v22 }
 0x2d0   : > { %v754_v23 = vpop.permute.xlu0 %753 }
 0x2d1   : > { %v809_v24 = vsel %vm799_vm11, %v752_v13, %v754_v23  ;;  %v810_v25 = vsel %vm799_vm11, %v754_v23, %v756_v55 }
 0x2d2   : > { %863 = vmatprep.subr.bf16.mxu0 %v810_v25 }
 0x2d3   : > { %864 = vmatpush1.bf16.msra.mxu0 %v809_v24 }
 0x2d4   : > { %v762_v26 = vpop.permute.xlu0 %761 }
 0x2d5   : > { %v812_v27 = vsel %vm799_vm11, %v760_v54, %v762_v26  ;;  %v813_v28 = vsel %vm799_vm11, %v762_v26, %v764_v59 }
 0x2d6   : > { %865 = vmatprep.subr.bf16.mxu0 %v813_v28 }
 0x2d7   : > { %866 = vmatpush1.bf16.msra.mxu0 %v812_v27 }
 0x2d8   : > { %v770_v29 = vpop.permute.xlu0 %769 }
 0x2d9   : > { %v815_v30 = vsel %vm799_vm11, %v768_v58, %v770_v29  ;;  %v816_v31 = vsel %vm799_vm11, %v770_v29, %v772_v5 }
 0x2da   : > { %867 = vmatprep.subr.bf16.mxu0 %v816_v31  ;;  %v716_v46 = vpop.permute.xlu1 %715 }
 0x2db   : > { %868 = vmatpush1.bf16.msra.mxu0 %v815_v30 }
 0x2dc   : > { %v778_v32 = vpop.permute.xlu0 %777 }
 0x2dd   : > { %v818_v33 = vsel %vm799_vm11, %v776_v2, %v778_v32  ;;  %v819_v34 = vsel %vm799_vm11, %v778_v32, %v780_v8  ;;  %v1456_v2 = vstv %s971_s21 }
 0x2de   : > { %869 = vmatprep.subr.bf16.mxu0 %v819_v34  ;;  %v413_v62 = vpop.permute.xlu1 %412 }
 0x2df   : > { %870 = vmatpush1.bf16.msra.mxu0 %v818_v33  ;;  %v541_v6 = vadd.f32 %v1299_v60, %v413_v62 }
 0x2e0   : > { %v786_v35 = vpop.permute.xlu0 %785 }
 0x2e1   : > { %v821_v36 = vsel %vm799_vm11, %v784_v4, %v786_v35  ;;  %v822_v37 = vsel %vm799_vm11, %v786_v35, %v788_v11  ;;  %v557_v17 = vmax.f32 %v541_v6, 0.0 }
 0x2e2   : > { %871 = vmatprep.subr.bf16.mxu0 %v822_v37 }
 0x2e3   : > { %872 = vmatpush1.bf16.msra.mxu0 %v821_v36 }
 0x2e4   : > { %v794_v38 = vpop.permute.xlu0 %793 }
 0x2e5   : > { %v825_v39 = vsel %vm799_vm11, %v794_v38, %v796_v14 }
 0x2e6   : > { %873 = vmatprep.subr.bf16.mxu0 %v825_v39 }
 0x2e8   : > { %v792_v40 = vpop.permute.xlu0 %791 }
 0x2e9   : > { %v824_v41 = vsel %vm799_vm11, %v792_v40, %v794_v38 }
 0x2ea   : > { %874 = vmatpush1.bf16.msra.mxu0 %v824_v41  ;;  %v489_v41 = vadd.f32 %v1305_v1, %v413_v62 }
 0x2ed   : > { %890 = vmatmul.mubr.bf16.vlgmr.msra.gmra.mrb[8].mxu0 %v1110_v20 }
 0x2f9   : > { %v711_v42 = vpop.permute.xlu0 %710 }
 0x2fd   : > { %v408_v59 = vpop.permute.xlu0 %407 }
 0x2fe   : > { %v538_v4 = vadd.f32 %v1297_v57, %v408_v59  ;;  %v485_v37 = vadd.f32 %v1301_v61, %v408_v59  ;;  %v487_v39 = vadd.f32 %v1303_v63, %v408_v59 }
 0x300   : > { %v554_v12 = vmax.f32 %v538_v4, 0.0  ;;  %v553_v63 = vmax.f32 %v487_v39, 0.0 }
 0x3a1   : > { %v934_v43 = vpop.f32.mrb[8].mxu1 }
 0x3a2   : > { %v935_v44 = vadd.f32 %v934_v43, %v711_v42  ;;  %v936_v45 = vpop.f32.mrb[9].mxu1 }
 0x3a3   : > { %v937_v47 = vpop.f32.mrb[10].mxu1 }
 0x3a4   : > { %v943_v48 = vsub.f32 0.0, %v935_v44  ;;  %v938_v49 = vadd.f32 %v937_v47, %v716_v46  ;;  %v939_v50 = vpop.f32.mrb[11].mxu1  ;;  %v491_v44 = vadd.f32 %v1307_v3, %v413_v62  ;;  %v552_v47 = vmax.f32 %v485_v37, 0.0 }
 0x3a5   : > { %v555_v50 = vmax.f32 %v489_v41, 0.0 }
 0x3a6   : > { %v951_v51 = vmul.f32 1.442695, %v943_v48  ;;  %v946_v52 = vsub.f32 0.0, %v938_v49 }
 0x3a8   : > { %1113 = vpow2.f32 %v951_v51  ;;  %v957_v53 = vmul.f32 1.442695, %v946_v52 }
 0x3aa   : > { %1115 = vpow2.f32 %v957_v53  ;;  %v556_v53 = vmax.f32 %v491_v44, 0.0 }
 0x3b2   : > { %v1114_v54 = vpop.eup %1113 }
 0x3b3   : > { %v961_v55 = vadd.f32 1.0, %v1114_v54 }
 0x3b4   : > { %v1116_v56 = vpop.eup %1115 }
 0x3b5   : > { %1117 = vrcp.f32 %v961_v55  ;;  %v964_v58 = vadd.f32 1.0, %v1116_v56 }
 0x3b7   : > { %1119 = vrcp.f32 %v964_v58 }
 0x3bf   : > { %v1118_v5 = vpop.eup %1117 }
 0x3c0   : > { %v975_v7 = vmul.f32 %v1118_v5, %v1456_v2  ;;  %v891_v8 = vpop.f32.mrb[8].mxu0 }
 0x3c1   : > { %v1120_v9 = vpop.eup %1119  ;;  %v892_v10 = vadd.f32 %v891_v8, %v711_v42  ;;  %v893_v11 = vpop.f32.mrb[9].mxu0 }
 0x3c2   : > { %v981_v13 = vsub.f32 1.0, %v975_v7  ;;  %v978_v14 = vmul.f32 %v1120_v9, %v1456_v2  ;;  %v894_v15 = vadd.f32 %v893_v11, %v711_v42  ;;  %v895_v16 = vpop.f32.mrb[10].mxu0 }
 0x3c3   : > { %v941_v57 = vsub.f32 0.0, %v892_v10  ;;  %v896_v60 = vadd.f32 %v895_v16, %v716_v46  ;;  %v897_v18 = vpop.f32.mrb[11].mxu0 }
 0x3c4   : > { %v987_v19 = vmul.f32 %v981_v13, %v554_v12  ;;  %v984_v20 = vsub.f32 1.0, %v978_v14  ;;  %v942_v21 = vsub.f32 0.0, %v894_v15  ;;  %v898_v22 = vadd.f32 %v897_v18, %v716_v46 }
 0x3c5   : > { %v947_v0 = vmul.f32 1.442695, %v941_v57  ;;  %v944_v23 = vsub.f32 0.0, %v896_v60 }
 0x3c6   : > { %993 = vst.msk [vmem:[%s1466_s25 + $0x10] sm:$0xff] %vm621_vm10, %v987_v19  ;;  %v990_v24 = vmul.f32 %v984_v20, %v557_v17  ;;  %v949_v25 = vmul.f32 1.442695, %v942_v21  ;;  %v945_v26 = vsub.f32 0.0, %v898_v22 }
 0x3c7   : > { %1121 = vpow2.f32 %v947_v0  ;;  %v953_v27 = vmul.f32 1.442695, %v944_v23 }
 0x3c8   : > { %996 = vst.msk [vmem:[%s1466_s25 + $0x28] sm:$0xff] %vm621_vm10, %v990_v24  ;;  %1123 = vpow2.f32 %v949_v25  ;;  %v955_v28 = vmul.f32 1.442695, %v945_v26 }
 0x3c9   : > { %1125 = vpow2.f32 %v953_v27 }
 0x3ca   : > { %1127 = vpow2.f32 %v955_v28 }
 0x3d1   : > { %v1122_v29 = vpop.eup %1121 }
 0x3d2   : > { %v1124_v30 = vpop.eup %1123  ;;  %v959_v31 = vadd.f32 1.0, %v1122_v29 }
 0x3d3   : > { %v1126_v32 = vpop.eup %1125  ;;  %v960_v33 = vadd.f32 1.0, %v1124_v30 }
 0x3d4   : > { %v1128_v34 = vpop.eup %1127  ;;  %1129 = vrcp.f32 %v959_v31  ;;  %v962_v35 = vadd.f32 1.0, %v1126_v32 }
 0x3d5   : > { %1131 = vrcp.f32 %v960_v33  ;;  %v963_v36 = vadd.f32 1.0, %v1128_v34 }
 0x3d6   : > { %1133 = vrcp.f32 %v962_v35 }
 0x3d7   : > { %1135 = vrcp.f32 %v963_v36 }
 0x3de   : > { %v1130_v38 = vpop.eup %1129 }
 0x3df   : > { %v1132_v40 = vpop.eup %1131  ;;  %v973_v42 = vmul.f32 %v1130_v38, %v1456_v2 }
 0x3e0   : > { %v1134_v43 = vpop.eup %1133  ;;  %v974_v45 = vmul.f32 %v1132_v40, %v1456_v2 }
 0x3e1   : > { %v1136_v46 = vpop.eup %1135  ;;  %v979_v48 = vsub.f32 1.0, %v973_v42  ;;  %v976_v61 = vmul.f32 %v1134_v43, %v1456_v2 }
 0x3e2   : > { %v980_v49 = vsub.f32 1.0, %v974_v45  ;;  %v977_v1 = vmul.f32 %v1136_v46, %v1456_v2 }
 0x3e3   : > { %v985_v51 = vmul.f32 %v979_v48, %v552_v47  ;;  %v982_v52 = vsub.f32 1.0, %v976_v61 }
 0x3e4   : > { %v986_v54 = vmul.f32 %v980_v49, %v553_v63  ;;  %v983_v3 = vsub.f32 1.0, %v977_v1 }
 0x3e5   : > { %991 = vst [vmem:[%s1466_s25] sm:$0xff] %v985_v51  ;;  %v988_v55 = vmul.f32 %v982_v52, %v555_v50 }
 0x3e6   : > { %992 = vst [vmem:[%s1466_s25 + $0x8] sm:$0xff] %v986_v54  ;;  %v989_v56 = vmul.f32 %v983_v3, %v556_v53 }
 0x3e7   : > { %994 = vst [vmem:[%s1466_s25 + $0x18] sm:$0xff] %v988_v55 }
 0x3e8   : > { %995 = vst [vmem:[%s1466_s25 + $0x20] sm:$0xff] %v989_v56 }
 0x3e9 PF: > { %s18_s26 = sadd.s32 1, %s1143_s26  }
 0x3ea   : > { %p15_p4 = scmp.ge.s32.totalorder %s18_s26, 4  }
 0x3ec   :  { %17 = sbr.rel (!%p15_p4) target bundleno = 2 (0x2), region = 78 }

</bundles_post_ra>
